<compile_context>
chip_gen: v7x
topology: tpu7x:2x2x1
jax: 0.10.0
libtpu: 0.0.40
codegen_flags: <defaults>
</compile_context>

<pallas_src>
import functools
import math

import jax
import jax.numpy as jnp
from jax.experimental import pallas as pl
from jax.experimental.pallas import tpu as pltpu


def _round_up(v, m):
    return ((v + m - 1) // m) * m


def _freq_enc_kernel(x_ref, f_ref, o_ref, *, d, k):
    # x_ref: (tn, d)   f_ref: (1, d*k) tiled freqs   o_ref: (tn, d*k)
    pair_w = 2 * k
    n_pairs = d // 2

    if n_pairs:
        # Hoisted lane mask for one pair-block: lanes [0, k) take the even
        # feature, lanes [k, 2k) take the odd feature.  One vreg, reused.
        lane = jax.lax.broadcasted_iota(jnp.int32, (1, pair_w), 1)
        left = lane < k

    for p in range(n_pairs):
        i = 2 * p
        lo = i * k
        xl = x_ref[:, i:i + 1]          # (tn, 1)  even feature (per-iter slice)
        xr = x_ref[:, i + 1:i + 2]      # (tn, 1)  odd feature
        xpair = jnp.where(left, xl, xr)             # (tn, 2k) lane-bcast select
        # Full-width, 128-lane-aligned store (lo is a multiple of 2k).
        o_ref[:, lo:lo + pair_w] = xpair * f_ref[:, lo:lo + pair_w]

    if d % 2:
        # Leftover feature for odd d (correct but masked store; not hit for d=8).
        i = d - 1
        lo = i * k
        o_ref[:, lo:lo + k] = x_ref[:, i:i + 1] * f_ref[:, lo:lo + k]


def freq_encoding(x, n_freqs=64, max_freq=10, block_rows=8192):
    """Pallas implementation of FreqEncoding.forward."""
    assert x.ndim in (2, 3), "FreqEncoding expects 2-D or 3-D input"

    lead_shape = x.shape[:-1]
    D = x.shape[-1]
    K = n_freqs
    DK = D * K

    # Deterministic "buffer" construction, identical to the torch __init__.
    freqs = (jnp.arange(1, n_freqs + 1, dtype=jnp.float32) / n_freqs * max_freq)
    freqs = freqs.astype(x.dtype)
    # Lane-dense tiled frequency row: f_tiled[0, i*K + j] = freqs[j].
    f_tiled = jnp.tile(freqs, (D,)).reshape(1, DK)

    N = math.prod(lead_shape)
    x2 = x.reshape(N, D)

    # Row tile: multiple of 16 (covers f32 sublane tiling and bf16 packing).
    # Capped at ~half the aligned row count so the grid has >=2 steps whenever
    # N spans >=2 minimum tiles (v7x has 2 TensorCores per chip).
    ALIGN = 16
    n_aligned = _round_up(max(N, 1), ALIGN)
    half = _round_up(n_aligned // 2 if n_aligned >= 2 * ALIGN else n_aligned, ALIGN)
    tn = max(ALIGN, min(int(block_rows), half))

    grid = (pl.cdiv(N, tn),)
    kernel = functools.partial(_freq_enc_kernel, d=D, k=K)

    out = pl.pallas_call(
        kernel,
        out_shape=jax.ShapeDtypeStruct((N, DK), x.dtype),
        grid_spec=pltpu.PrefetchScalarGridSpec(
            num_scalar_prefetch=0,
            grid=grid,
            in_specs=[
                pl.BlockSpec((tn, D), lambda i: (i, 0)),    # x row tile
                pl.BlockSpec((1, DK), lambda i: (0, 0)),    # tiled freqs (resident)
            ],
            out_specs=pl.BlockSpec((tn, DK), lambda i: (i, 0)),  # lane-dense output
        ),
        compiler_params=pltpu.CompilerParams(
            dimension_semantics=("parallel",),
            # 2x16 MiB output + 2x4 MiB lane-padded input ~= 40 MiB at tn=8192;
            # 48 MiB fits v5e/v6e (128 MiB) and v7x (64 MiB physical VMEM).
            vmem_limit_bytes=48 << 20,
        ),
    )(x2, f_tiled)

    # Metadata-only reshape back to (..., D*K); no slicing / extra copies.
    return out.reshape(*lead_shape, DK)


def _reference(x, n_freqs=64, max_freq=10):
    # Pure-broadcast reference (exact elementwise f32 math).
    freqs = (jnp.arange(1, n_freqs + 1, dtype=jnp.float32) / n_freqs * max_freq)
    freqs = freqs.astype(x.dtype)
    x_enc = x[..., :, None] * freqs            # (..., D, K)
    return x_enc.reshape(*x.shape[:-1], -1)


if __name__ == "__main__":
    key = jax.random.PRNGKey(0)
    k3, k2 = jax.random.split(key)

    # 3-D case: (batch=2, channels=4, d=8) -> (2, 4, 8*64)
    x3 = jax.random.normal(k3, (2, 4, 8), dtype=jnp.float32)
    out3 = jax.block_until_ready(freq_encoding(x3))
    ref3 = _reference(x3)
    assert out3.shape == (2, 4, 8 * 64), out3.shape
    assert jnp.allclose(out3, ref3, atol=1e-6, rtol=1e-6)

    # 2-D case: (batch=2, d=8) -> (2, 8*64)
    x2 = jax.random.normal(k2, (2, 8), dtype=jnp.float32)
    out2 = jax.block_until_ready(freq_encoding(x2))
    ref2 = _reference(x2)
    assert out2.shape == (2, 8 * 64), out2.shape
    assert jnp.allclose(out2, ref2, atol=1e-6, rtol=1e-6)

    print("KERNEL_OK")
</pallas_src>

<mosaic_0001>
module attributes {stable_mosaic.version = 11 : i64} {
  func.func @_freq_enc_kernel(%arg0: i32, %arg1: memref<16x8xf32, #tpu.memory_space<vmem>>, %arg2: memref<1x512xf32, #tpu.memory_space<vmem>>, %arg3: memref<16x512xf32, #tpu.memory_space<vmem>>) attributes {dimension_semantics = [#tpu.dimension_semantics<parallel>], iteration_bounds = array<i64: 1>, scalar_prefetch = 0 : i64, scratch_operands = 0 : i64, tpu.core_type = #tpu.core_type<tc>, window_params = [{transform_indices = @transform_0, window_bounds = array<i64: 16, 8>}, {pipeline_mode = #tpu.pipeline_mode<synchronous>, transform_indices = @transform_1, window_bounds = array<i64: 1, 512>}, {transform_indices = @transform_2, window_bounds = array<i64: 16, 512>}]} {
    %0 = tpu.iota {dimensions = array<i32: 1>} : vector<1x128xi32>
    %c64_i32 = arith.constant 64 : i32
    %1 = vector.broadcast %c64_i32 : i32 to vector<1x128xi32>
    %2 = arith.cmpi slt, %0, %1 : vector<1x128xi32>
    %c0 = arith.constant 0 : index
    %c0_0 = arith.constant 0 : index
    %3 = vector.load %arg1[%c0, %c0_0] : memref<16x8xf32, #tpu.memory_space<vmem>>, vector<16x1xf32>
    %c0_1 = arith.constant 0 : index
    %c1 = arith.constant 1 : index
    %4 = vector.load %arg1[%c0_1, %c1] : memref<16x8xf32, #tpu.memory_space<vmem>>, vector<16x1xf32>
    %5 = vector.shape_cast %2 : vector<1x128xi1> to vector<1x128xi1>
    %6 = vector.broadcast %5 : vector<1x128xi1> to vector<16x128xi1>
    %7 = vector.shape_cast %3 : vector<16x1xf32> to vector<16x1xf32>
    %8 = vector.broadcast %7 : vector<16x1xf32> to vector<16x128xf32>
    %9 = vector.shape_cast %4 : vector<16x1xf32> to vector<16x1xf32>
    %10 = vector.broadcast %9 : vector<16x1xf32> to vector<16x128xf32>
    %11 = arith.select %6, %8, %10 : vector<16x128xi1>, vector<16x128xf32>
    %c0_2 = arith.constant 0 : index
    %c0_3 = arith.constant 0 : index
    %12 = vector.load %arg2[%c0_2, %c0_3] : memref<1x512xf32, #tpu.memory_space<vmem>>, vector<1x128xf32>
    %13 = vector.broadcast %12 : vector<1x128xf32> to vector<16x128xf32>
    %14 = arith.mulf %11, %13 : vector<16x128xf32>
    %c0_4 = arith.constant 0 : index
    %c0_5 = arith.constant 0 : index
    %15 = vector.load %arg3[%c0_4, %c0_5] : memref<16x512xf32, #tpu.memory_space<vmem>>, vector<16x128xf32>
    tpu.vector_store %arg3[%c0_4, %c0_5], %14 {strides = array<i32>} : memref<16x512xf32, #tpu.memory_space<vmem>>, vector<16x128xf32>,
    %c0_6 = arith.constant 0 : index
    %c2 = arith.constant 2 : index
    %16 = vector.load %arg1[%c0_6, %c2] : memref<16x8xf32, #tpu.memory_space<vmem>>, vector<16x1xf32>
    %c0_7 = arith.constant 0 : index
    %c3 = arith.constant 3 : index
    %17 = vector.load %arg1[%c0_7, %c3] : memref<16x8xf32, #tpu.memory_space<vmem>>, vector<16x1xf32>
    %18 = vector.shape_cast %2 : vector<1x128xi1> to vector<1x128xi1>
    %19 = vector.broadcast %18 : vector<1x128xi1> to vector<16x128xi1>
    %20 = vector.shape_cast %16 : vector<16x1xf32> to vector<16x1xf32>
    %21 = vector.broadcast %20 : vector<16x1xf32> to vector<16x128xf32>
    %22 = vector.shape_cast %17 : vector<16x1xf32> to vector<16x1xf32>
    %23 = vector.broadcast %22 : vector<16x1xf32> to vector<16x128xf32>
    %24 = arith.select %19, %21, %23 : vector<16x128xi1>, vector<16x128xf32>
    %c0_8 = arith.constant 0 : index
    %c128 = arith.constant 128 : index
    %25 = vector.load %arg2[%c0_8, %c128] : memref<1x512xf32, #tpu.memory_space<vmem>>, vector<1x128xf32>
    %26 = vector.broadcast %25 : vector<1x128xf32> to vector<16x128xf32>
    %27 = arith.mulf %24, %26 : vector<16x128xf32>
    %c0_9 = arith.constant 0 : index
    %c128_10 = arith.constant 128 : index
    %28 = vector.load %arg3[%c0_9, %c128_10] : memref<16x512xf32, #tpu.memory_space<vmem>>, vector<16x128xf32>
    tpu.vector_store %arg3[%c0_9, %c128_10], %27 {strides = array<i32>} : memref<16x512xf32, #tpu.memory_space<vmem>>, vector<16x128xf32>,
    %c0_11 = arith.constant 0 : index
    %c4 = arith.constant 4 : index
    %29 = vector.load %arg1[%c0_11, %c4] : memref<16x8xf32, #tpu.memory_space<vmem>>, vector<16x1xf32>
    %c0_12 = arith.constant 0 : index
    %c5 = arith.constant 5 : index
    %30 = vector.load %arg1[%c0_12, %c5] : memref<16x8xf32, #tpu.memory_space<vmem>>, vector<16x1xf32>
    %31 = vector.shape_cast %2 : vector<1x128xi1> to vector<1x128xi1>
    %32 = vector.broadcast %31 : vector<1x128xi1> to vector<16x128xi1>
    %33 = vector.shape_cast %29 : vector<16x1xf32> to vector<16x1xf32>
    %34 = vector.broadcast %33 : vector<16x1xf32> to vector<16x128xf32>
    %35 = vector.shape_cast %30 : vector<16x1xf32> to vector<16x1xf32>
    %36 = vector.broadcast %35 : vector<16x1xf32> to vector<16x128xf32>
    %37 = arith.select %32, %34, %36 : vector<16x128xi1>, vector<16x128xf32>
    %c0_13 = arith.constant 0 : index
    %c256 = arith.constant 256 : index
    %38 = vector.load %arg2[%c0_13, %c256] : memref<1x512xf32, #tpu.memory_space<vmem>>, vector<1x128xf32>
    %39 = vector.broadcast %38 : vector<1x128xf32> to vector<16x128xf32>
    %40 = arith.mulf %37, %39 : vector<16x128xf32>
    %c0_14 = arith.constant 0 : index
    %c256_15 = arith.constant 256 : index
    %41 = vector.load %arg3[%c0_14, %c256_15] : memref<16x512xf32, #tpu.memory_space<vmem>>, vector<16x128xf32>
    tpu.vector_store %arg3[%c0_14, %c256_15], %40 {strides = array<i32>} : memref<16x512xf32, #tpu.memory_space<vmem>>, vector<16x128xf32>,
    %c0_16 = arith.constant 0 : index
    %c6 = arith.constant 6 : index
    %42 = vector.load %arg1[%c0_16, %c6] : memref<16x8xf32, #tpu.memory_space<vmem>>, vector<16x1xf32>
    %c0_17 = arith.constant 0 : index
    %c7 = arith.constant 7 : index
    %43 = vector.load %arg1[%c0_17, %c7] : memref<16x8xf32, #tpu.memory_space<vmem>>, vector<16x1xf32>
    %44 = vector.shape_cast %2 : vector<1x128xi1> to vector<1x128xi1>
    %45 = vector.broadcast %44 : vector<1x128xi1> to vector<16x128xi1>
    %46 = vector.shape_cast %42 : vector<16x1xf32> to vector<16x1xf32>
    %47 = vector.broadcast %46 : vector<16x1xf32> to vector<16x128xf32>
    %48 = vector.shape_cast %43 : vector<16x1xf32> to vector<16x1xf32>
    %49 = vector.broadcast %48 : vector<16x1xf32> to vector<16x128xf32>
    %50 = arith.select %45, %47, %49 : vector<16x128xi1>, vector<16x128xf32>
    %c0_18 = arith.constant 0 : index
    %c384 = arith.constant 384 : index
    %51 = vector.load %arg2[%c0_18, %c384] : memref<1x512xf32, #tpu.memory_space<vmem>>, vector<1x128xf32>
    %52 = vector.broadcast %51 : vector<1x128xf32> to vector<16x128xf32>
    %53 = arith.mulf %50, %52 : vector<16x128xf32>
    %c0_19 = arith.constant 0 : index
    %c384_20 = arith.constant 384 : index
    %54 = vector.load %arg3[%c0_19, %c384_20] : memref<16x512xf32, #tpu.memory_space<vmem>>, vector<16x128xf32>
    tpu.vector_store %arg3[%c0_19, %c384_20], %53 {strides = array<i32>} : memref<16x512xf32, #tpu.memory_space<vmem>>, vector<16x128xf32>,
    return
  }
  func.func @transform_0(%arg0: i32) -> (i32, i32) {
    %c0_i32 = arith.constant 0 : i32
    %c0_i32_0 = arith.constant 0 : i32
    return %arg0, %c0_i32 : i32, i32
  }
  func.func @transform_1(%arg0: i32) -> (i32, i32) {
    %c0_i32 = arith.constant 0 : i32
    %c0_i32_0 = arith.constant 0 : i32
    %c0_i32_1 = arith.constant 0 : i32
    return %c0_i32, %c0_i32_0 : i32, i32
  }
  func.func @transform_2(%arg0: i32) -> (i32, i32) {
    %c0_i32 = arith.constant 0 : i32
    %c0_i32_0 = arith.constant 0 : i32
    return %arg0, %c0_i32 : i32, i32
  }
}

</mosaic_0001>

<bundles_post_ra>
// kernel: tpu_custom_call.1
= control target key start
LH: loop header
LB: loop body
LE: loop exit
PB: predicated region body
PF: predicated region fallthrough
CT: control target
= control target key end

     0   :  { %7 = vsyncpa [#allocation3], 0  ;;  %s371_s0 = inlined_call_operand.hbm [shape: f32[8,8], index: 0, kind: input, shape index: {}]   ;;  %s372_s1 = inlined_call_operand.hbm [shape: f32[1,512], index: 1, kind: input, shape index: {}]   ;;  %s373_s2 = inlined_call_operand.hbm [shape: f32[8,512], index: 2, kind: output, shape index: {}]  }
   0x1   :  { %8 = vsyncpa [#allocation6], 0 }
   0x2   :  { %9 = vsyncpa [#allocation4], 0 }
   0x3   :  { %14 = vsyncadd [#allocation3], 128  ;;  %s297_s9 = smov [#allocation2]   ;;  %s225_s13 = scalar_lea.hbm %s371_s0, 128 }
   0x4   :  { %s15_s10 = sshll.u32 %s297_s9, 4  ;;  %p226_p0 = scmp.ne.s32.totalorder %s371_s0, %s225_s13  ;;  %s16_s10 = int_to_ptr.vmem [resolvable:$true] %s15_s10 }
   0x5   :  { %p229_p1 = scmp.lt.u32.totalorder %s225_s13, %s371_s0 }
   0x7   :  { %p231_p2 = pnand %p229_p1, %p226_p0 }
   0x9   :  { %234 = shalt.err (!%p231_p2)
}
   0xa   :  { %s235_s18 = scalar_lea.vmem %s16_s10, 128  ;;  %s239_s19 = scalar_lea.vmem %s16_s10, 256 }
   0xb   :  { %p236_p3 = scmp.ne.s32.totalorder %s16_s10, %s235_s18  ;;  %p240_p4 = scmp.lt.s32.totalorder %s16_s10, %s16_s10 }
   0xc   :  { %p241_p5 = scmp.lt.s32.totalorder %s239_s19, %s235_s18 }
   0xe   :  { %p242_p6 = por %p241_p5, %p240_p4 }
  0x10   :  { %p243_p7 = pnand %p242_p6, %p236_p3 }
  0x12   :  { %246 = shalt.err (!%p243_p7)
}
  0x13   :  { %s298_s20 = smov 128   ;;  %s299_s21 = smov 8  }
  0x14   :  { %21 = dma.hbm_to_vmem [thread:$0]  %s371_s0, 128, %s16_s10, [#allocation3], %s298_s20, %s298_s20, %s299_s21  }
  0x15   :  { %s300_s24 = smov [#allocation5]   ;;  %s247_s28 = scalar_lea.hbm %s372_s1, 64 }
  0x16   :  { %s28_s25 = sshll.u32 %s300_s24, 4  ;;  %p248_p8 = scmp.ne.s32.totalorder %s372_s1, %s247_s28  ;;  %s29_s25 = int_to_ptr.vmem [resolvable:$true] %s28_s25 }
  0x17   :  { %p251_p9 = scmp.lt.u32.totalorder %s247_s28, %s372_s1 }
  0x19   :  { %p253_p10 = pnand %p251_p9, %p248_p8 }
  0x1b   :  { %256 = shalt.err (!%p253_p10)
}
  0x1c   :  { %s257_s5 = scalar_lea.vmem %s29_s25, 64  ;;  %p262_p12 = scmp.lt.s32.totalorder %s29_s25, %s29_s25 }
  0x1d   :  { %p258_p11 = scmp.ne.s32.totalorder %s29_s25, %s257_s5  ;;  %p263_p13 = scmp.lt.s32.totalorder %s257_s5, %s257_s5 }
  0x1f   :  { %p264_p0 = por %p263_p13, %p262_p12 }
  0x21   :  { %p265_p1 = pnand %p264_p0, %p258_p11 }
  0x23   :  { %268 = shalt.err (!%p265_p1)
}
  0x24   :  { %31 = dma.hbm_to_vmem [thread:$0]  %s372_s1, 64, %s29_s25, [#allocation6]  }
  0x25   :  { %291 = dma.done.wait [#allocation3], 256  }
  0x26   :  { %292 = vsyncadd [#allocation3], 4294967040 }
  0x27   :  { %293 = dma.done.wait [#allocation6], 64  }
  0x28   :  { %294 = vsyncadd [#allocation6], 4294967232  ;;  %v301_v0 = vmov 1   ;;  %v302_v1 = vmov 0   ;;  %v41_v2 = vld [vmem:[#allocation2] sm:$0xff]  ;;  %v42_v3 = vld [vmem:[#allocation2 + $0x8] sm:$0xff]  ;;  %v38_v10 = vlaneseq }
  0x29   :  { %213 = vset.pattern.permute.xlu1 %v301_v0  ;;  %212 = vset.pattern.permute.xlu0 %v302_v1  ;;  %v303_v4 = vmov 2   ;;  %v304_v5 = vmov 3   ;;  %v305_v6 = vmov 4   ;;  %v306_v7 = vmov 5   ;;  %v193_v12 = vld [vmem:[#allocation5] ss:$0 sm:$0xff] }
  0x2a   :  { %56 = vperm.xlu1 %213, %v41_v2   ;;  %47 = vperm.xlu0 %212, %v41_v2   ;;  %v307_v8 = vmov 6   ;;  %v308_v9 = vmov 7   ;;  %v39_v11 = vand.u32 127, %v38_v10  ;;  %v194_v23 = vld [vmem:[#allocation5 + $0x1] ss:$0 sm:$0xff] }
  0x2b   :  { %v195_v30 = vld [vmem:[#allocation5 + $0x2] ss:$0 sm:$0xff]  ;;  %v196_v40 = vld [vmem:[#allocation5 + $0x3] ss:$0 sm:$0xff] }
  0x2c   :  { %vm40_vm0 = vcmp.lt.s32.totalorder %v39_v11, 64 }
  0x2e   :  { %60 = vperm.xlu1 %213, %v42_v3   ;;  %52 = vperm.xlu0 %212, %v42_v3  }
  0x32   :  { %215 = vset.pattern.permute.xlu1 %v303_v4  ;;  %214 = vset.pattern.permute.xlu0 %v303_v4 }
  0x33   :  { %85 = vperm.xlu1 %215, %v42_v3   ;;  %80 = vperm.xlu0 %214, %v41_v2  }
  0x37   :  { %216 = vset.pattern.permute.xlu1 %v304_v5  ;;  %217 = vset.pattern.permute.xlu0 %v304_v5 }
  0x38   :  { %89 = vperm.xlu1 %216, %v41_v2   ;;  %93 = vperm.xlu0 %217, %v42_v3  }
  0x3c   :  { %218 = vset.pattern.permute.xlu1 %v305_v6  ;;  %219 = vset.pattern.permute.xlu0 %v306_v7 }
  0x3d   :  { %113 = vperm.xlu1 %218, %v41_v2   ;;  %122 = vperm.xlu0 %219, %v41_v2  }
  0x41   :  { %118 = vperm.xlu1 %218, %v42_v3   ;;  %222 = vset.pattern.permute.xlu0 %v307_v8 }
  0x42   :  { %151 = vperm.xlu0 %222, %v42_v3  }
  0x45   :  { %220 = vset.pattern.permute.xlu1 %v306_v7 }
  0x46   :  { %126 = vperm.xlu1 %220, %v42_v3   ;;  %224 = vset.pattern.permute.xlu0 %v308_v9 }
  0x4a   :  { %221 = vset.pattern.permute.xlu1 %v307_v8 }
  0x4b   :  { %146 = vperm.xlu1 %221, %v41_v2  }
  0x4f   :  { %223 = vset.pattern.permute.xlu1 %v308_v9 }
  0x50   :  { %155 = vperm.xlu1 %223, %v41_v2  }
  0x54   :  { %159 = vperm.xlu1 %223, %v42_v3  }
  0xa9   :  { %v57_v13 = vpop.permute.xlu1 %56  ;;  %v48_v14 = vpop.permute.xlu0 %47 }
  0xaa   :  { %v63_v15 = vsel %vm40_vm0, %v48_v14, %v57_v13 }
  0xab   :  { %v72_v16 = vmul.f32 %v193_v12, %v63_v15 }
  0xad   :  { %74 = vst [vmem:[#allocation7] sm:$0xff] %v72_v16  ;;  %v61_v17 = vpop.permute.xlu1 %60  ;;  %v53_v18 = vpop.permute.xlu0 %52 }
  0xae   :  { %v64_v19 = vsel %vm40_vm0, %v53_v18, %v61_v17 }
  0xaf   :  { %v73_v20 = vmul.f32 %v193_v12, %v64_v19 }
  0xb1   :  { %75 = vst [vmem:[#allocation7 + $0x20] sm:$0xff] %v73_v20 }
  0xb2   :  { %v86_v21 = vpop.permute.xlu1 %85  ;;  %v81_v22 = vpop.permute.xlu0 %80 }
  0xb7   :  { %v90_v24 = vpop.permute.xlu1 %89  ;;  %v94_v25 = vpop.permute.xlu0 %93 }
  0xb8   :  { %v96_v26 = vsel %vm40_vm0, %v81_v22, %v90_v24  ;;  %v97_v27 = vsel %vm40_vm0, %v86_v21, %v94_v25 }
  0xb9   :  { %v105_v28 = vmul.f32 %v194_v23, %v96_v26  ;;  %v106_v29 = vmul.f32 %v194_v23, %v97_v27 }
  0xbb   :  { %107 = vst [vmem:[#allocation7 + $0x8] sm:$0xff] %v105_v28  ;;  %108 = vst [vmem:[#allocation7 + $0x28] sm:$0xff] %v106_v29 }
  0xbc   :  { %v114_v31 = vpop.permute.xlu1 %113  ;;  %v123_v32 = vpop.permute.xlu0 %122 }
  0xbd   :  { %v129_v33 = vsel %vm40_vm0, %v114_v31, %v123_v32 }
  0xbe   :  { %v138_v34 = vmul.f32 %v195_v30, %v129_v33 }
  0xc0   :  { %140 = vst [vmem:[#allocation7 + $0x10] sm:$0xff] %v138_v34  ;;  %v119_v35 = vpop.permute.xlu1 %118 }
  0xc1   :  { %v152_v44 = vpop.permute.xlu0 %151 }
  0xc5   :  { %v127_v36 = vpop.permute.xlu1 %126 }
  0xc6   :  { %v130_v37 = vsel %vm40_vm0, %v119_v35, %v127_v36 }
  0xc7   :  { %v139_v38 = vmul.f32 %v195_v30, %v130_v37 }
  0xc9   :  { %141 = vst [vmem:[#allocation7 + $0x30] sm:$0xff] %v139_v38 }
  0xca   :  { %v147_v39 = vpop.permute.xlu1 %146 }
  0xcf   :  { %v156_v41 = vpop.permute.xlu1 %155 }
  0xd0   :  { %v162_v42 = vsel %vm40_vm0, %v147_v39, %v156_v41 }
  0xd1   :  { %v171_v43 = vmul.f32 %v196_v40, %v162_v42 }
  0xd3   :  { %173 = vst [vmem:[#allocation7 + $0x18] sm:$0xff] %v171_v43  ;;  %v160_v45 = vpop.permute.xlu1 %159 }
  0xd4   :  { %v163_v46 = vsel %vm40_vm0, %v152_v44, %v160_v45 }
  0xd5   :  { %v172_v47 = vmul.f32 %v196_v40, %v163_v46 }
  0xd7   :  { %174 = vst [vmem:[#allocation7 + $0x38] sm:$0xff] %v172_v47 }
  0xd8   :  { %179 = vsyncadd [#allocation4], 512  ;;  %s309_s1 = smov [#allocation7]  }
  0xd9   :  { %s180_s7 = sshll.u32 %s309_s1, 4  ;;  %s181_s7 = int_to_ptr.vmem [resolvable:$true] %s180_s7 }
  0xda   :  { %s269_s8 = scalar_lea.vmem %s181_s7, 512  ;;  %s273_s9 = scalar_lea.vmem %s181_s7, 1024 }
  0xdb   :  { %p270_p2 = scmp.ne.s32.totalorder %s181_s7, %s269_s8  ;;  %p274_p3 = scmp.lt.s32.totalorder %s181_s7, %s181_s7 }
  0xdc   :  { %p275_p4 = scmp.lt.s32.totalorder %s273_s9, %s269_s8 }
  0xde   :  { %p276_p5 = por %p275_p4, %p274_p3 }
  0xe0   :  { %p277_p6 = pnand %p276_p5, %p270_p2 }
  0xe2   :  { %280 = shalt.err (!%p277_p6)
}
  0xe3   :  { %s281_s12 = scalar_lea.hbm %s373_s2, 512 }
  0xe4   :  { %p282_p7 = scmp.ne.s32.totalorder %s373_s2, %s281_s12  ;;  %p285_p8 = scmp.lt.u32.totalorder %s281_s12, %s373_s2 }
  0xe6   :  { %p287_p9 = pnand %p285_p8, %p282_p7 }
  0xe8   :  { %290 = shalt.err (!%p287_p9)
}
  0xe9   :  { %s310_s17 = smov 512   ;;  %s311_s18 = smov 32  }
  0xea   :  { %186 = dma.vmem_to_hbm [thread:$0]  %s181_s7, 512, %s373_s2, [#allocation4], %s310_s17, %s310_s17, %s311_s18  }
  0xeb   :  { %295 = dma.done.wait [#allocation4], 1024  }
  0xec   :  { %296 = vsyncadd [#allocation4], 4294966272 }
  0xed   :  { %190 = vsyncpa [#allocation3], 1 }
  0xee   :  { %191 = vsyncpa [#allocation6], 1 }
  0xef   :  { %192 = vsyncpa [#allocation4], 1 }

</bundles_post_ra>
